<compile_context>
chip_gen: v7x
topology: tpu7x:2x2x1
jax: 0.10.0
libtpu: 0.0.40
codegen_flags: <defaults>
</compile_context>

<pallas_src>
import numpy as np
import jax
import jax.numpy as jnp
from jax.experimental import pallas as pl
from jax.experimental.pallas import tpu as pltpu


# ----------------------------------------------------------------------------
# Helpers
# ----------------------------------------------------------------------------
def _gelu_exact(x):
    # PyTorch nn.GELU() default (erf-based, not tanh approximation).
    return 0.5 * x * (1.0 + jax.lax.erf(x * 0.7071067811865476))


class Args:
    batchsize = 2
    task_num = [1, 1, 1, 1]
    encoder_dim = [16, 32, 64, 128]
    dim = 32
    embed_dim = 48
    trainsize = 64


# ----------------------------------------------------------------------------
# Static slab layout (row offsets are Python ints, baked into the kernel)
# ----------------------------------------------------------------------------
def build_layout(args):
    ed, emb, dim = args.encoder_dim, args.embed_dim, args.dim
    tn, B = args.task_num, args.batchsize

    col_offs, off = [], 0
    for e in ed:
        col_offs.append(off)
        off += e
    K = off
    Kp = ((K + 127) // 128) * 128          # MXU-friendly padded K

    tok = 2 * sum(tn)                      # prompt tokens per batch element
    n_prompt_rows = B * tok

    lay = {"col_offs": col_offs, "K": K, "Kp": Kp,
           "tok": tok, "n_prompt_rows": n_prompt_rows}

    # slab48 (width = embed_dim): stacked linearp W, mlp1 W1/W2, prompt-row
    # biases, mlp1 biases.
    lay["s48_wp"] = 0
    lay["s48_w11"] = Kp
    lay["s48_w12"] = Kp + dim
    lay["s48_brow"] = Kp + dim + emb
    lay["s48_b11"] = lay["s48_brow"] + n_prompt_rows
    lay["s48_b12"] = lay["s48_b11"] + 1
    lay["s48_rows"] = lay["s48_b12"] + 1

    # slab64 (width = encoder_dim[2]): mlp32 weights + biases.
    lay["s64_w321"] = 0
    lay["s64_w322"] = ed[3]
    lay["s64_b321"] = ed[3] + ed[2]
    lay["s64_b322"] = lay["s64_b321"] + 1
    lay["s64_rows"] = lay["s64_b322"] + 1

    # slab32 (width = dim): mlp16 weights + biases + norm1 gamma/beta.
    lay["s32_w161"] = 0
    lay["s32_w162"] = ed[2]
    lay["s32_b161"] = ed[2] + dim
    lay["s32_b162"] = lay["s32_b161"] + 1
    lay["s32_g"] = lay["s32_b162"] + 1
    lay["s32_be"] = lay["s32_g"] + 1
    lay["s32_rows"] = lay["s32_be"] + 1
    return lay


# ----------------------------------------------------------------------------
# Parameter construction (deterministic, synthetic) + one-time packing
# ----------------------------------------------------------------------------
def init_params(key, args):
    ks = iter(jax.random.split(key, 64))

    def lin(din, dout):
        return (0.02 * jax.random.normal(next(ks), (din, dout), jnp.float32),
                0.02 * jax.random.normal(next(ks), (dout,), jnp.float32))

    p = {}
    for i in range(4):
        p[f"task_promptS_{i+1}"] = jax.random.normal(
            next(ks), (args.batchsize, args.task_num[i], args.encoder_dim[i]),
            jnp.float32)
        p[f"task_promptE_{i+1}"] = jax.random.normal(
            next(ks), (args.batchsize, args.task_num[i], args.encoder_dim[i]),
            jnp.float32)
        p[f"linearp{i+1}"] = lin(args.encoder_dim[i], args.embed_dim)

    ed = args.encoder_dim
    p["mlp32_1"] = lin(ed[3], ed[2])
    p["mlp32_2"] = lin(ed[2], ed[2])
    p["mlp16_1"] = lin(ed[2], args.dim)
    p["mlp16_2"] = lin(args.dim, args.dim)
    p["norm1_g"] = jnp.ones((args.dim,), jnp.float32)
    p["norm1_b"] = jnp.zeros((args.dim,), jnp.float32)
    p["mlp1_1"] = lin(args.dim, args.embed_dim)
    p["mlp1_2"] = lin(args.embed_dim, args.embed_dim)
    return p


def pack_params(p, args, lay):
    """One-time (outside jit) packing of all params into 4 contiguous slabs."""
    ed, emb, dim = args.encoder_dim, args.embed_dim, args.dim
    tn, B = args.task_num, args.batchsize

    # slab48: [linearp1..4 W (K rows, zero-padded to Kp); mlp1 W1; mlp1 W2;
    #          per-prompt-row bias; mlp1 b1; mlp1 b2]
    s48 = np.zeros((lay["s48_rows"], emb), np.float32)
    for i in range(4):
        w, _ = p[f"linearp{i+1}"]
        c0 = lay["col_offs"][i]
        s48[c0:c0 + ed[i], :] = np.asarray(w)
    w11, b11 = p["mlp1_1"]
    w12, b12 = p["mlp1_2"]
    s48[lay["s48_w11"]:lay["s48_w11"] + dim, :] = np.asarray(w11)
    s48[lay["s48_w12"]:lay["s48_w12"] + emb, :] = np.asarray(w12)
    s48[lay["s48_b11"], :] = np.asarray(b11)
    s48[lay["s48_b12"], :] = np.asarray(b12)

    # prompt slab: row-major in final (B, 2*sum(tn)) order; each projection's
    # tokens live in their own K-column segment (zeros elsewhere), so one
    # matmul against the stacked linearp weights computes all 4 projections.
    ps = np.zeros((lay["n_prompt_rows"], lay["Kp"]), np.float32)
    for b_idx in range(B):
        row = b_idx * lay["tok"]
        for i in range(4):
            S = np.asarray(p[f"task_promptS_{i+1}"][b_idx])
            E = np.asarray(p[f"task_promptE_{i+1}"][b_idx])
            bias = np.asarray(p[f"linearp{i+1}"][1])
            c0 = lay["col_offs"][i]
            for t in range(tn[i]):
                ps[row, c0:c0 + ed[i]] = S[t]
                s48[lay["s48_brow"] + row, :] = bias
                row += 1
            for t in range(tn[i]):
                ps[row, c0:c0 + ed[i]] = E[t]
                s48[lay["s48_brow"] + row, :] = bias
                row += 1

    # slab64: mlp32
    s64 = np.zeros((lay["s64_rows"], ed[2]), np.float32)
    w321, b321 = p["mlp32_1"]
    w322, b322 = p["mlp32_2"]
    s64[lay["s64_w321"]:lay["s64_w321"] + ed[3], :] = np.asarray(w321)
    s64[lay["s64_w322"]:lay["s64_w322"] + ed[2], :] = np.asarray(w322)
    s64[lay["s64_b321"], :] = np.asarray(b321)
    s64[lay["s64_b322"], :] = np.asarray(b322)

    # slab32: mlp16 + norm1
    s32 = np.zeros((lay["s32_rows"], dim), np.float32)
    w161, b161 = p["mlp16_1"]
    w162, b162 = p["mlp16_2"]
    s32[lay["s32_w161"]:lay["s32_w161"] + ed[2], :] = np.asarray(w161)
    s32[lay["s32_w162"]:lay["s32_w162"] + dim, :] = np.asarray(w162)
    s32[lay["s32_b161"], :] = np.asarray(b161)
    s32[lay["s32_b162"], :] = np.asarray(b162)
    s32[lay["s32_g"], :] = np.asarray(p["norm1_g"])
    s32[lay["s32_be"], :] = np.asarray(p["norm1_b"])

    return {"prompt": jnp.asarray(ps), "s48": jnp.asarray(s48),
            "s64": jnp.asarray(s64), "s32": jnp.asarray(s32)}


# ----------------------------------------------------------------------------
# Fused forward (single grid-free pallas_call, 4 outputs)
# ----------------------------------------------------------------------------
def make_forward(args):
    lay = build_layout(args)
    ed, emb, dim = args.encoder_dim, args.embed_dim, args.dim
    f32t = jnp.float32

    def kernel(prompt_ref, s48_ref, s64_ref, s32_ref,
               x32_ref, x16_ref, x11_ref,
               tp_out, f32_out, f16_out, sig_out):
        # --- linearp1..4 task-prompt projections: one block-diagonal dot ---
        wp = s48_ref[lay["s48_wp"]:lay["s48_wp"] + lay["Kp"], :]
        brow = s48_ref[lay["s48_brow"]:lay["s48_brow"] + lay["n_prompt_rows"], :]
        tp = jnp.dot(prompt_ref[...], wp, preferred_element_type=f32t) + brow
        tp_out[...] = tp.astype(tp_out.dtype)

        # --- mlp32: Linear(ed3,ed2) -> GELU -> Linear(ed2,ed2) ---
        h = jnp.dot(x32_ref[...], s64_ref[lay["s64_w321"]:lay["s64_w321"] + ed[3], :],
                    preferred_element_type=f32t)
        h = _gelu_exact(h + s64_ref[lay["s64_b321"]:lay["s64_b321"] + 1, :])
        y = jnp.dot(h, s64_ref[lay["s64_w322"]:lay["s64_w322"] + ed[2], :],
                    preferred_element_type=f32t)
        y = y + s64_ref[lay["s64_b322"]:lay["s64_b322"] + 1, :]
        f32_out[...] = y.astype(f32_out.dtype)

        # --- mlp16 -> norm1 -> mlp1 (fused chain) ---
        h = jnp.dot(x16_ref[...], s32_ref[lay["s32_w161"]:lay["s32_w161"] + ed[2], :],
                    preferred_element_type=f32t)
        h = _gelu_exact(h + s32_ref[lay["s32_b161"]:lay["s32_b161"] + 1, :])
        t = jnp.dot(h, s32_ref[lay["s32_w162"]:lay["s32_w162"] + dim, :],
                    preferred_element_type=f32t)
        t = t + s32_ref[lay["s32_b162"]:lay["s32_b162"] + 1, :]
        # LayerNorm (eps = 1e-5, nn.LayerNorm default, biased variance)
        mu = jnp.mean(t, axis=-1, keepdims=True)
        var = jnp.mean(jnp.square(t - mu), axis=-1, keepdims=True)
        tnrm = (t - mu) * jax.lax.rsqrt(var + 1e-5)
        tnrm = (tnrm * s32_ref[lay["s32_g"]:lay["s32_g"] + 1, :]
                + s32_ref[lay["s32_be"]:lay["s32_be"] + 1, :])
        h2 = jnp.dot(tnrm, s48_ref[lay["s48_w11"]:lay["s48_w11"] + dim, :],
                     preferred_element_type=f32t)
        h2 = _gelu_exact(h2 + s48_ref[lay["s48_b11"]:lay["s48_b11"] + 1, :])
        y16 = jnp.dot(h2, s48_ref[lay["s48_w12"]:lay["s48_w12"] + emb, :],
                      preferred_element_type=f32t)
        y16 = y16 + s48_ref[lay["s48_b12"]:lay["s48_b12"] + 1, :]
        f16_out[...] = y16.astype(f16_out.dtype)

        # --- sigmoid(fea_1_1) on a lane-dense (rows, 128) slab ---
        sig_out[...] = jax.nn.sigmoid(x11_ref[...].astype(f32t)).astype(sig_out.dtype)

    vmem = pl.BlockSpec(memory_space=pltpu.MemorySpace.VMEM)

    def forward(packed, x, rgb_fea_1_16, rgb_fea_1_32, fea_1_1_raw):
        # TODO(synk): swin_transformer backbone is external to MTPNet.py; its
        #             token outputs rgb_fea_1_16 / rgb_fea_1_32 are inputs.
        # TODO(synk): fuse_32_16, token_Transformer and Decoder are external to
        #             MTPNet.py; fea_1_1 (decoder output) is an input here.
        del x
        B_, n16, _ = rgb_fea_1_16.shape
        _, n32, _ = rgb_fea_1_32.shape
        x16 = rgb_fea_1_16.reshape(B_ * n16, ed[2])
        x32 = rgb_fea_1_32.reshape(B_ * n32, ed[3])

        sig_shape = fea_1_1_raw.shape
        flat = fea_1_1_raw.reshape(-1)
        n = flat.shape[0]
        lanes = 128
        nrows = pl.cdiv(n, lanes)
        npad = nrows * lanes
        if npad != n:
            flat = jnp.pad(flat, (0, npad - n))
        x11 = flat.reshape(nrows, lanes)

        tp, f32o, f16o, sig = pl.pallas_call(
            kernel,
            out_shape=(
                jax.ShapeDtypeStruct((lay["n_prompt_rows"], emb), jnp.float32),
                jax.ShapeDtypeStruct((B_ * n32, ed[2]), jnp.float32),
                jax.ShapeDtypeStruct((B_ * n16, emb), jnp.float32),
                jax.ShapeDtypeStruct((nrows, lanes), fea_1_1_raw.dtype),
            ),
            in_specs=[vmem] * 7,
            out_specs=(vmem, vmem, vmem, vmem),
        )(packed["prompt"], packed["s48"], packed["s64"], packed["s32"],
          x32, x16, x11)

        task_prompt = tp.reshape(B_, lay["tok"], emb)
        rgb_fea_1_32 = f32o.reshape(B_, n32, ed[2])
        rgb_fea_1_16 = f16o.reshape(B_, n16, emb)
        fea_1_1 = sig.reshape(-1)[:n].reshape(sig_shape)
        return task_prompt, rgb_fea_1_32, rgb_fea_1_16, fea_1_1

    return jax.jit(forward)


# ----------------------------------------------------------------------------
# Pure-JAX reference (for correctness check only)
# ----------------------------------------------------------------------------
def reference_forward(p, rgb16, rgb32, fea11):
    hp = jax.lax.Precision.HIGHEST

    def lin(xx, w, b):
        return jnp.dot(xx, w, precision=hp, preferred_element_type=jnp.float32) + b

    tps = []
    for i in range(1, 5):
        cat = jnp.concatenate((p[f"task_promptS_{i}"], p[f"task_promptE_{i}"]), axis=1)
        w, b = p[f"linearp{i}"]
        tps.append(jnp.einsum("btk,kn->btn", cat, w, precision=hp) + b)
    task_prompt = jnp.concatenate(tps, axis=1)

    w1, b1 = p["mlp32_1"]; w2, b2 = p["mlp32_2"]
    f32o = lin(_gelu_exact(lin(rgb32, w1, b1)), w2, b2)

    w1, b1 = p["mlp16_1"]; w2, b2 = p["mlp16_2"]
    t = lin(_gelu_exact(lin(rgb16, w1, b1)), w2, b2)
    mu = jnp.mean(t, -1, keepdims=True)
    var = jnp.mean(jnp.square(t - mu), -1, keepdims=True)
    t = (t - mu) * jax.lax.rsqrt(var + 1e-5) * p["norm1_g"] + p["norm1_b"]
    w3, b3 = p["mlp1_1"]; w4, b4 = p["mlp1_2"]
    f16o = lin(_gelu_exact(lin(t, w3, b3)), w4, b4)

    return task_prompt, f32o, f16o, jax.nn.sigmoid(fea11)


# ----------------------------------------------------------------------------
# Main
# ----------------------------------------------------------------------------
if __name__ == "__main__":
    args = Args()
    key = jax.random.PRNGKey(0)
    k_param, k_x, k16, k32, k11 = jax.random.split(key, 5)

    params = init_params(k_param, args)
    lay = build_layout(args)
    packed = pack_params(params, args, lay)       # one-time, outside the jit path
    forward = make_forward(args)

    B = args.batchsize
    H = W = args.trainsize
    n16 = (H // 16) * (W // 16)                   # 16 tokens
    n32 = (H // 32) * (W // 32)                   # 4 tokens

    x = jax.random.normal(k_x, (B, 3, H, W), jnp.float32)      # unused (backbone TODO)
    rgb_fea_1_16 = jax.random.normal(k16, (B, n16, args.encoder_dim[2]), jnp.float32)
    rgb_fea_1_32 = jax.random.normal(k32, (B, n32, args.encoder_dim[3]), jnp.float32)
    fea_1_1_raw = jax.random.normal(k11, (B, H * W, 1), jnp.float32)

    outs = forward(packed, x, rgb_fea_1_16, rgb_fea_1_32, fea_1_1_raw)
    jax.block_until_ready(outs)

    task_prompt, f32o, f16o, f11 = outs
    assert task_prompt.shape == (B, 2 * sum(args.task_num), args.embed_dim)
    assert f32o.shape == (B, n32, args.encoder_dim[2])
    assert f16o.shape == (B, n16, args.embed_dim)
    assert f11.shape == fea_1_1_raw.shape

    ref = reference_forward(params, rgb_fea_1_16, rgb_fea_1_32, fea_1_1_raw)
    for got, want in zip(outs, ref):
        np.testing.assert_allclose(np.asarray(got), np.asarray(want),
                                   rtol=1e-3, atol=1e-3)

    print("KERNEL_OK")
</pallas_src>

<mosaic_0001>
module attributes {stable_mosaic.version = 11 : i64} {
  func.func @kernel(%arg0: memref<16x256xf32, #tpu.memory_space<vmem>>, %arg1: memref<354x48xf32, #tpu.memory_space<vmem>>, %arg2: memref<194x64xf32, #tpu.memory_space<vmem>>, %arg3: memref<100x32xf32, #tpu.memory_space<vmem>>, %arg4: memref<8x128xf32, #tpu.memory_space<vmem>>, %arg5: memref<32x64xf32, #tpu.memory_space<vmem>>, %arg6: memref<64x128xf32, #tpu.memory_space<vmem>>, %arg7: memref<16x48xf32, #tpu.memory_space<vmem>>, %arg8: memref<8x64xf32, #tpu.memory_space<vmem>>, %arg9: memref<32x48xf32, #tpu.memory_space<vmem>>, %arg10: memref<64x128xf32, #tpu.memory_space<vmem>>) attributes {dimension_semantics = [], scalar_prefetch = 0 : i64, scratch_operands = 0 : i64, tpu.core_type = #tpu.core_type<tc>} {
    %c0 = arith.constant 0 : index
    %c0_0 = arith.constant 0 : index
    %0 = vector.load %arg1[%c0, %c0_0] : memref<354x48xf32, #tpu.memory_space<vmem>>, vector<256x48xf32>
    %c336 = arith.constant 336 : index
    %c0_1 = arith.constant 0 : index
    %1 = vector.load %arg1[%c336, %c0_1] : memref<354x48xf32, #tpu.memory_space<vmem>>, vector<16x48xf32>
    %c0_2 = arith.constant 0 : index
    %c0_3 = arith.constant 0 : index
    %2 = vector.load %arg0[%c0_2, %c0_3] : memref<16x256xf32, #tpu.memory_space<vmem>>, vector<16x256xf32>
    %cst = arith.constant dense<0.000000e+00> : vector<16x48xf32>
    %3 = tpu.matmul %2, %0, %cst {dimension_numbers = #tpu.dot_dimension_numbers<[1], [0], [0], [1], [0, 0, 1, 1], [], []>} : vector<16x256xf32>, vector<256x48xf32>, vector<16x48xf32> -> vector<16x48xf32>
    %4 = arith.addf %3, %1 : vector<16x48xf32>
    %c0_4 = arith.constant 0 : index
    %c0_5 = arith.constant 0 : index
    %5 = vector.load %arg7[%c0_4, %c0_5] : memref<16x48xf32, #tpu.memory_space<vmem>>, vector<16x48xf32>
    tpu.vector_store %arg7[%c0_4, %c0_5], %4 {strides = array<i32>} : memref<16x48xf32, #tpu.memory_space<vmem>>, vector<16x48xf32>,
    %c0_6 = arith.constant 0 : index
    %c0_7 = arith.constant 0 : index
    %6 = vector.load %arg4[%c0_6, %c0_7] : memref<8x128xf32, #tpu.memory_space<vmem>>, vector<8x128xf32>
    %c0_8 = arith.constant 0 : index
    %c0_9 = arith.constant 0 : index
    %7 = vector.load %arg2[%c0_8, %c0_9] : memref<194x64xf32, #tpu.memory_space<vmem>>, vector<128x64xf32>
    %cst_10 = arith.constant dense<0.000000e+00> : vector<8x64xf32>
    %8 = tpu.matmul %6, %7, %cst_10 {dimension_numbers = #tpu.dot_dimension_numbers<[1], [0], [0], [1], [0, 0, 1, 1], [], []>} : vector<8x128xf32>, vector<128x64xf32>, vector<8x64xf32> -> vector<8x64xf32>
    %c192 = arith.constant 192 : index
    %c0_11 = arith.constant 0 : index
    %9 = vector.load %arg2[%c192, %c0_11] : memref<194x64xf32, #tpu.memory_space<vmem>>, vector<1x64xf32>
    %10 = vector.broadcast %9 : vector<1x64xf32> to vector<8x64xf32>
    %11 = arith.addf %8, %10 : vector<8x64xf32>
    %cst_12 = arith.constant 5.000000e-01 : f32
    %12 = vector.broadcast %cst_12 : f32 to vector<8x64xf32>
    %13 = arith.mulf %12, %11 : vector<8x64xf32>
    %cst_13 = arith.constant 0.707106769 : f32
    %14 = vector.broadcast %cst_13 : f32 to vector<8x64xf32>
    %15 = arith.mulf %11, %14 : vector<8x64xf32>
    %16 = math.erf %15 : vector<8x64xf32>
    %cst_14 = arith.constant 1.000000e+00 : f32
    %17 = vector.broadcast %cst_14 : f32 to vector<8x64xf32>
    %18 = arith.addf %17, %16 : vector<8x64xf32>
    %19 = arith.mulf %13, %18 : vector<8x64xf32>
    %c128 = arith.constant 128 : index
    %c0_15 = arith.constant 0 : index
    %20 = vector.load %arg2[%c128, %c0_15] : memref<194x64xf32, #tpu.memory_space<vmem>>, vector<64x64xf32>
    %cst_16 = arith.constant dense<0.000000e+00> : vector<8x64xf32>
    %21 = tpu.matmul %19, %20, %cst_16 {dimension_numbers = #tpu.dot_dimension_numbers<[1], [0], [0], [1], [0, 0, 1, 1], [], []>} : vector<8x64xf32>, vector<64x64xf32>, vector<8x64xf32> -> vector<8x64xf32>
    %c193 = arith.constant 193 : index
    %c0_17 = arith.constant 0 : index
    %22 = vector.load %arg2[%c193, %c0_17] : memref<194x64xf32, #tpu.memory_space<vmem>>, vector<1x64xf32>
    %23 = vector.broadcast %22 : vector<1x64xf32> to vector<8x64xf32>
    %24 = arith.addf %21, %23 : vector<8x64xf32>
    %c0_18 = arith.constant 0 : index
    %c0_19 = arith.constant 0 : index
    %25 = vector.load %arg8[%c0_18, %c0_19] : memref<8x64xf32, #tpu.memory_space<vmem>>, vector<8x64xf32>
    tpu.vector_store %arg8[%c0_18, %c0_19], %24 {strides = array<i32>} : memref<8x64xf32, #tpu.memory_space<vmem>>, vector<8x64xf32>,
    %c0_20 = arith.constant 0 : index
    %c0_21 = arith.constant 0 : index
    %26 = vector.load %arg5[%c0_20, %c0_21] : memref<32x64xf32, #tpu.memory_space<vmem>>, vector<32x64xf32>
    %c0_22 = arith.constant 0 : index
    %c0_23 = arith.constant 0 : index
    %27 = vector.load %arg3[%c0_22, %c0_23] : memref<100x32xf32, #tpu.memory_space<vmem>>, vector<64x32xf32>
    %cst_24 = arith.constant dense<0.000000e+00> : vector<32x32xf32>
    %28 = tpu.matmul %26, %27, %cst_24 {dimension_numbers = #tpu.dot_dimension_numbers<[1], [0], [0], [1], [0, 0, 1, 1], [], []>} : vector<32x64xf32>, vector<64x32xf32>, vector<32x32xf32> -> vector<32x32xf32>
    %c96 = arith.constant 96 : index
    %c0_25 = arith.constant 0 : index
    %29 = vector.load %arg3[%c96, %c0_25] : memref<100x32xf32, #tpu.memory_space<vmem>>, vector<1x32xf32>
    %30 = vector.broadcast %29 : vector<1x32xf32> to vector<32x32xf32>
    %31 = arith.addf %28, %30 : vector<32x32xf32>
    %cst_26 = arith.constant 5.000000e-01 : f32
    %32 = vector.broadcast %cst_26 : f32 to vector<32x32xf32>
    %33 = arith.mulf %32, %31 : vector<32x32xf32>
    %cst_27 = arith.constant 0.707106769 : f32
    %34 = vector.broadcast %cst_27 : f32 to vector<32x32xf32>
    %35 = arith.mulf %31, %34 : vector<32x32xf32>
    %36 = math.erf %35 : vector<32x32xf32>
    %cst_28 = arith.constant 1.000000e+00 : f32
    %37 = vector.broadcast %cst_28 : f32 to vector<32x32xf32>
    %38 = arith.addf %37, %36 : vector<32x32xf32>
    %39 = arith.mulf %33, %38 : vector<32x32xf32>
    %c64 = arith.constant 64 : index
    %c0_29 = arith.constant 0 : index
    %40 = vector.load %arg3[%c64, %c0_29] : memref<100x32xf32, #tpu.memory_space<vmem>>, vector<32x32xf32>
    %cst_30 = arith.constant dense<0.000000e+00> : vector<32x32xf32>
    %41 = tpu.matmul %39, %40, %cst_30 {dimension_numbers = #tpu.dot_dimension_numbers<[1], [0], [0], [1], [0, 0, 1, 1], [], []>} : vector<32x32xf32>, vector<32x32xf32>, vector<32x32xf32> -> vector<32x32xf32>
    %c97 = arith.constant 97 : index
    %c0_31 = arith.constant 0 : index
    %42 = vector.load %arg3[%c97, %c0_31] : memref<100x32xf32, #tpu.memory_space<vmem>>, vector<1x32xf32>
    %43 = vector.broadcast %42 : vector<1x32xf32> to vector<32x32xf32>
    %44 = arith.addf %41, %43 : vector<32x32xf32>
    %cst_32 = arith.constant dense<0.000000e+00> : vector<32xf32>
    %45 = vector.multi_reduction <add>, %44, %cst_32 [1] : vector<32x32xf32> to vector<32xf32>
    %46 = vector.shape_cast %45 : vector<32xf32> to vector<32x1xf32>
    %cst_33 = arith.constant 3.200000e+01 : f32
    %47 = vector.broadcast %cst_33 : f32 to vector<32x1xf32>
    %48 = arith.divf %46, %47 : vector<32x1xf32>
    %49 = vector.broadcast %48 : vector<32x1xf32> to vector<32x32xf32>
    %50 = arith.subf %44, %49 : vector<32x32xf32>
    %51 = arith.mulf %50, %50 : vector<32x32xf32>
    %cst_34 = arith.constant dense<0.000000e+00> : vector<32xf32>
    %52 = vector.multi_reduction <add>, %51, %cst_34 [1] : vector<32x32xf32> to vector<32xf32>
    %53 = vector.shape_cast %52 : vector<32xf32> to vector<32x1xf32>
    %cst_35 = arith.constant 3.200000e+01 : f32
    %54 = vector.broadcast %cst_35 : f32 to vector<32x1xf32>
    %55 = arith.divf %53, %54 : vector<32x1xf32>
    %56 = vector.broadcast %48 : vector<32x1xf32> to vector<32x32xf32>
    %57 = arith.subf %44, %56 : vector<32x32xf32>
    %cst_36 = arith.constant 9.99999974E-6 : f32
    %58 = vector.broadcast %cst_36 : f32 to vector<32x1xf32>
    %59 = arith.addf %55, %58 : vector<32x1xf32>
    %60 = math.rsqrt %59 : vector<32x1xf32>
    %61 = vector.broadcast %60 : vector<32x1xf32> to vector<32x32xf32>
    %62 = arith.mulf %57, %61 : vector<32x32xf32>
    %c98 = arith.constant 98 : index
    %c0_37 = arith.constant 0 : index
    %63 = vector.load %arg3[%c98, %c0_37] : memref<100x32xf32, #tpu.memory_space<vmem>>, vector<1x32xf32>
    %64 = vector.broadcast %63 : vector<1x32xf32> to vector<32x32xf32>
    %65 = arith.mulf %62, %64 : vector<32x32xf32>
    %c99 = arith.constant 99 : index
    %c0_38 = arith.constant 0 : index
    %66 = vector.load %arg3[%c99, %c0_38] : memref<100x32xf32, #tpu.memory_space<vmem>>, vector<1x32xf32>
    %67 = vector.broadcast %66 : vector<1x32xf32> to vector<32x32xf32>
    %68 = arith.addf %65, %67 : vector<32x32xf32>
    %c256 = arith.constant 256 : index
    %c0_39 = arith.constant 0 : index
    %69 = vector.load %arg1[%c256, %c0_39] : memref<354x48xf32, #tpu.memory_space<vmem>>, vector<32x48xf32>
    %cst_40 = arith.constant dense<0.000000e+00> : vector<32x48xf32>
    %70 = tpu.matmul %68, %69, %cst_40 {dimension_numbers = #tpu.dot_dimension_numbers<[1], [0], [0], [1], [0, 0, 1, 1], [], []>} : vector<32x32xf32>, vector<32x48xf32>, vector<32x48xf32> -> vector<32x48xf32>
    %c352 = arith.constant 352 : index
    %c0_41 = arith.constant 0 : index
    %71 = vector.load %arg1[%c352, %c0_41] : memref<354x48xf32, #tpu.memory_space<vmem>>, vector<1x48xf32>
    %72 = vector.broadcast %71 : vector<1x48xf32> to vector<32x48xf32>
    %73 = arith.addf %70, %72 : vector<32x48xf32>
    %cst_42 = arith.constant 5.000000e-01 : f32
    %74 = vector.broadcast %cst_42 : f32 to vector<32x48xf32>
    %75 = arith.mulf %74, %73 : vector<32x48xf32>
    %cst_43 = arith.constant 0.707106769 : f32
    %76 = vector.broadcast %cst_43 : f32 to vector<32x48xf32>
    %77 = arith.mulf %73, %76 : vector<32x48xf32>
    %78 = math.erf %77 : vector<32x48xf32>
    %cst_44 = arith.constant 1.000000e+00 : f32
    %79 = vector.broadcast %cst_44 : f32 to vector<32x48xf32>
    %80 = arith.addf %79, %78 : vector<32x48xf32>
    %81 = arith.mulf %75, %80 : vector<32x48xf32>
    %c288 = arith.constant 288 : index
    %c0_45 = arith.constant 0 : index
    %82 = vector.load %arg1[%c288, %c0_45] : memref<354x48xf32, #tpu.memory_space<vmem>>, vector<48x48xf32>
    %cst_46 = arith.constant dense<0.000000e+00> : vector<32x48xf32>
    %83 = tpu.matmul %81, %82, %cst_46 {dimension_numbers = #tpu.dot_dimension_numbers<[1], [0], [0], [1], [0, 0, 1, 1], [], []>} : vector<32x48xf32>, vector<48x48xf32>, vector<32x48xf32> -> vector<32x48xf32>
    %c353 = arith.constant 353 : index
    %c0_47 = arith.constant 0 : index
    %84 = vector.load %arg1[%c353, %c0_47] : memref<354x48xf32, #tpu.memory_space<vmem>>, vector<1x48xf32>
    %85 = vector.broadcast %84 : vector<1x48xf32> to vector<32x48xf32>
    %86 = arith.addf %83, %85 : vector<32x48xf32>
    %c0_48 = arith.constant 0 : index
    %c0_49 = arith.constant 0 : index
    %87 = vector.load %arg9[%c0_48, %c0_49] : memref<32x48xf32, #tpu.memory_space<vmem>>, vector<32x48xf32>
    tpu.vector_store %arg9[%c0_48, %c0_49], %86 {strides = array<i32>} : memref<32x48xf32, #tpu.memory_space<vmem>>, vector<32x48xf32>,
    %c0_50 = arith.constant 0 : index
    %c0_51 = arith.constant 0 : index
    %88 = vector.load %arg6[%c0_50, %c0_51] : memref<64x128xf32, #tpu.memory_space<vmem>>, vector<64x128xf32>
    %89 = arith.negf %88 : vector<64x128xf32>
    %90 = math.exp %89 : vector<64x128xf32>
    %cst_52 = arith.constant 1.000000e+00 : f32
    %91 = vector.broadcast %cst_52 : f32 to vector<64x128xf32>
    %92 = arith.addf %91, %90 : vector<64x128xf32>
    %93 = arith.divf %91, %92 : vector<64x128xf32>
    %c0_53 = arith.constant 0 : index
    %c0_54 = arith.constant 0 : index
    %94 = vector.load %arg10[%c0_53, %c0_54] : memref<64x128xf32, #tpu.memory_space<vmem>>, vector<64x128xf32>
    tpu.vector_store %arg10[%c0_53, %c0_54], %93 {strides = array<i32>} : memref<64x128xf32, #tpu.memory_space<vmem>>, vector<64x128xf32>,
    return
  }
}

</mosaic_0001>

<bundles_post_ra>
// kernel: forward.1
= control target key start
LH: loop header
LB: loop body
LE: loop exit
PB: predicated region body
PF: predicated region fallthrough
CT: control target
= control target key end

     0   :  { %16 = vsyncpa [#allocation3], 0  ;;  %s2023_s0 = inlined_call_operand.vmem [shape: f32[16,256], index: 0, kind: input, shape index: {}]   ;;  %s2024_s1 = inlined_call_operand.vmem [shape: f32[354,48], index: 1, kind: input, shape index: {}]   ;;  %s2025_s2 = inlined_call_operand.vmem [shape: f32[194,64], index: 2, kind: input, shape index: {}]   ;;  %s2026_s3 = inlined_call_operand.vmem [shape: f32[100,32], index: 3, kind: input, shape index: {}]   ;;  %s2027_s4 = inlined_call_operand.vmem [shape: f32[8,128], index: 4, kind: input, shape index: {}]   ;;  %s2028_s5 = inlined_call_operand.vmem [shape: f32[32,64], index: 5, kind: input, shape index: {}]   ;;  %s2029_s6 = inlined_call_operand.vmem [shape: f32[64,128], index: 6, kind: input, shape index: {}]   ;;  %s2030_s7 = inlined_call_operand.hbm [shape: f32[16,48], index: 7, kind: output, shape index: {0}]   ;;  %s2031_s8 = inlined_call_operand.hbm [shape: f32[8,64], index: 8, kind: output, shape index: {1}]   ;;  %s2032_s9 = inlined_call_operand.hbm [shape: f32[32,48], index: 9, kind: output, shape index: {2}]   ;;  %s2033_s10 = inlined_call_operand.hbm [shape: f32[64,128], index: 10, kind: output, shape index: {3}]  }
   0x1   :  { %17 = vsyncpa [#allocation5], 0  ;;  %v150_v0 = vld [vmem:[%s2025_s2] sm:$0xff]  ;;  %v151_v1 = vld [vmem:[%s2025_s2 + $0x8] sm:$0xff]  ;;  %v1539_v3 = vmov 0.0|0.0   ;;  %vm1540_vm0 = vmmov 0  }
   0x2   :  { %v152_v2 = vld [vmem:[%s2025_s2 + $0x10] sm:$0xff]  ;;  %1298 = vmatprep.subr.bf16.mxu1 %v1539_v3  ;;  %v1299_v4 = vpack.c.bf16 %v151_v1, %v150_v0  ;;  %v153_v5 = vld [vmem:[%s2025_s2 + $0x18] sm:$0xff]  ;;  %v1541_v6 = vmov 0.0   ;;  %v154_v8 = vld [vmem:[%s2025_s2 + $0x20] sm:$0xff] }
   0x3   :  { %1176 = vmatprep.mubr.msk.f32.mxu1 %vm1540_vm0, %v1541_v6  ;;  %v1302_v7 = vpack.c.bf16 %v153_v5, %v152_v2  ;;  %v155_v9 = vld [vmem:[%s2025_s2 + $0x28] sm:$0xff]  ;;  %v156_v11 = vld [vmem:[%s2025_s2 + $0x30] sm:$0xff]  ;;  %v157_v12 = vld [vmem:[%s2025_s2 + $0x38] sm:$0xff] }
   0x4   :  { %1300 = vmatpush3.bf16.msra.mxu1 %v1299_v4  ;;  %v1305_v10 = vpack.c.bf16 %v155_v9, %v154_v8  ;;  %v49_v13 = vld [vmem:[%s2024_s1 + $0x80] sm:$0xff]  ;;  %v159_v15 = vld [vmem:[%s2025_s2 + $0x48] sm:$0xff]  ;;  %v1308_v19 = vpack.c.bf16 %v157_v12, %v156_v11  ;;  %v51_v22 = vld [vmem:[%s2024_s1 + $0x90] sm:$0xff] }
   0x5   :  { %1301 = vmatprep.subr.bf16.mxu1 %v1539_v3  ;;  %v158_v14 = vld [vmem:[%s2025_s2 + $0x40] sm:$0xff]  ;;  %v50_v16 = vld [vmem:[%s2024_s1 + $0x88] sm:$0xff]  ;;  %v52_v23 = vld [vmem:[%s2024_s1 + $0x98] sm:$0xff] }
   0x6   :  { %v33_v17 = vld [vmem:[%s2024_s1] sm:$0xff]  ;;  %v34_v18 = vld [vmem:[%s2024_s1 + $0x8] sm:$0xff]  ;;  %v1266_v20 = vpack.c.bf16 %v50_v16, %v49_v13  ;;  %v35_v24 = vld [vmem:[%s2024_s1 + $0x10] sm:$0xff]  ;;  %v1270_v25 = vpack.c.bf16 %v52_v23, %v51_v22  ;;  %v1311_v30 = vpack.c.bf16 %v159_v15, %v158_v14 }
   0x7   :  { %v1268_v21 = vpack.c.bf16 %v34_v18, %v33_v17  ;;  %v36_v26 = vld [vmem:[%s2024_s1 + $0x18] sm:$0xff]  ;;  %v53_v27 = vld [vmem:[%s2024_s1 + $0xa0] sm:$0xff]  ;;  %v54_v28 = vld [vmem:[%s2024_s1 + $0xa8] sm:$0xff] }
   0x8   :  { %1303 = vmatpush3.bf16.msra.mxu1 %v1302_v7  ;;  %1267 = vmatprep.subr.bf16.mxu0 %v1266_v20  ;;  %v1272_v29 = vpack.c.bf16 %v36_v26, %v35_v24  ;;  %v160_v31 = vld [vmem:[%s2025_s2 + $0x50] sm:$0xff]  ;;  %v1274_v32 = vpack.c.bf16 %v54_v28, %v53_v27  ;;  %v37_v33 = vld [vmem:[%s2024_s1 + $0x20] sm:$0xff]  ;;  %v38_v34 = vld [vmem:[%s2024_s1 + $0x28] sm:$0xff] }
   0x9   :  { %1304 = vmatprep.subr.bf16.mxu1 %v1539_v3  ;;  %1269 = vmatpush3.bf16.msra.mxu0 %v1268_v21  ;;  %v161_v35 = vld [vmem:[%s2025_s2 + $0x58] sm:$0xff]  ;;  %v55_v36 = vld [vmem:[%s2024_s1 + $0xb0] sm:$0xff]  ;;  %v162_v38 = vld [vmem:[%s2025_s2 + $0x60] sm:$0xff]  ;;  %v1276_v39 = vpack.c.bf16 %v38_v34, %v37_v33 }
   0xa   :  { %1271 = vmatprep.subr.bf16.mxu0 %v1270_v25  ;;  %v56_v37 = vld [vmem:[%s2024_s1 + $0xb8] sm:$0xff]  ;;  %v1314_v40 = vpack.c.bf16 %v161_v35, %v160_v31  ;;  %v163_v41 = vld [vmem:[%s2025_s2 + $0x68] sm:$0xff]  ;;  %v39_v43 = vld [vmem:[%s2024_s1 + $0x30] sm:$0xff] }
   0xb   :  { %v1278_v42 = vpack.c.bf16 %v56_v37, %v55_v36  ;;  %v40_v44 = vld [vmem:[%s2024_s1 + $0x38] sm:$0xff]  ;;  %v57_v45 = vld [vmem:[%s2024_s1 + $0xc0] sm:$0xff]  ;;  %v58_v46 = vld [vmem:[%s2024_s1 + $0xc8] sm:$0xff] }
   0xc   :  { %1306 = vmatpush3.bf16.msra.mxu1 %v1305_v10 }
   0xd   :  { %1307 = vmatprep.subr.bf16.mxu1 %v1539_v3  ;;  %1273 = vmatpush3.bf16.msra.mxu0 %v1272_v29 }
   0xe   :  { %1275 = vmatprep.subr.bf16.mxu0 %v1274_v32 }
  0x10   :  { %1309 = vmatpush3.bf16.msra.mxu1 %v1308_v19 }
  0x11   :  { %1310 = vmatprep.subr.bf16.mxu1 %v1539_v3 }
  0x14   :  { %1312 = vmatpush3.bf16.msra.mxu1 %v1311_v30 }
  0x15   :  { %1313 = vmatprep.subr.bf16.mxu1 %v1539_v3 }
  0x16   :  { %18 = vsyncpa [#allocation8], 0  ;;  %1277 = vmatpush3.bf16.msra.mxu0 %v1276_v39  ;;  %v1280_v47 = vpack.c.bf16 %v40_v44, %v39_v43  ;;  %v1317_v48 = vpack.c.bf16 %v163_v41, %v162_v38  ;;  %v164_v49 = vld [vmem:[%s2025_s2 + $0x70] sm:$0xff]  ;;  %v1282_v50 = vpack.c.bf16 %v58_v46, %v57_v45  ;;  %v41_v51 = vld [vmem:[%s2024_s1 + $0x40] sm:$0xff]  ;;  %vm259_vm1 = vcmask 523264   ;;  %s1543_s26 = smov [#allocation2]  }
  0x17   :  { %1279 = vmatprep.subr.bf16.mxu0 %v1278_v42  ;;  %v42_v52 = vld [vmem:[%s2024_s1 + $0x48] sm:$0xff]  ;;  %v165_v53 = vld [vmem:[%s2025_s2 + $0x78] sm:$0xff]  ;;  %v59_v54 = vld [vmem:[%s2024_s1 + $0xd0] sm:$0xff]  ;;  %vm477_vm2 = vcmask 261120   ;;  %vm146_vm3 = vcmask 392192   ;;  %s953_s27 = sshll.u32 %s1543_s26, 4  ;;  %s954_s27 = int_to_ptr.vmem [resolvable:$true] %s953_s27 }
  0x18   :  { %1315 = vmatpush3.bf16.msra.mxu1 %v1314_v40  ;;  %v60_v55 = vld [vmem:[%s2024_s1 + $0xd8] sm:$0xff]  ;;  %v338_v56 = vld [vmem:[%s2026_s3] sm:$0xff]  ;;  %v339_v57 = vld [vmem:[%s2026_s3 + $0x8] sm:$0xff]  ;;  %v1284_v58 = vpack.c.bf16 %v42_v52, %v41_v51  ;;  %v1320_v59 = vpack.c.bf16 %v165_v53, %v164_v49 }
  0x19   :  { %1316 = vmatprep.subr.bf16.mxu1 %v1539_v3  ;;  %v1286_v60 = vpack.c.bf16 %v60_v55, %v59_v54  ;;  %v43_v61 = vld [vmem:[%s2024_s1 + $0x50] sm:$0xff]  ;;  %v44_v62 = vld [vmem:[%s2024_s1 + $0x58] sm:$0xff]  ;;  %v1334_v63 = vpack.c.bf16 %v339_v57, %v338_v56  ;;  %v61_v2 = vld [vmem:[%s2024_s1 + $0xe0] sm:$0xff] }
  0x1a   :  { %1281 = vmatpush3.bf16.msra.mxu0 %v1280_v47  ;;  %v340_v0 = vld [vmem:[%s2026_s3 + $0x10] sm:$0xff]  ;;  %v341_v1 = vld [vmem:[%s2026_s3 + $0x18] sm:$0xff]  ;;  %v62_v4 = vld [vmem:[%s2024_s1 + $0xe8] sm:$0xff]  ;;  %v1288_v5 = vpack.c.bf16 %v44_v62, %v43_v61 }
  0x1b   :  { %1283 = vmatprep.subr.bf16.mxu0 %v1282_v50  ;;  %v149_v7 = vld [vmem:[%s2027_s4] sm:$0xff]  ;;  %v46_v9 = vld [vmem:[%s2024_s1 + $0x68] sm:$0xff]  ;;  %v1338_v10 = vpack.c.bf16 %v341_v1, %v340_v0  ;;  %v1290_v12 = vpack.c.bf16 %v62_v4, %v61_v2  ;;  %v63_v13 = vld [vmem:[%s2024_s1 + $0xf0] sm:$0xff] }
  0x1c   :  { %1318 = vmatpush3.bf16.msra.mxu1 %v1317_v48  ;;  %v45_v8 = vld [vmem:[%s2024_s1 + $0x60] sm:$0xff]  ;;  %v64_v14 = vld [vmem:[%s2024_s1 + $0xf8] sm:$0xff]  ;;  %v343_v16 = vld [vmem:[%s2026_s3 + $0x28] sm:$0xff] }
  0x1d   :  { %1319 = vmatprep.subr.bf16.mxu1 %v1539_v3  ;;  %v334_v11 = vld [vmem:[%s2028_s5] sm:$0xff]  ;;  %v1292_v17 = vpack.c.bf16 %v46_v9, %v45_v8  ;;  %v1294_v18 = vpack.c.bf16 %v64_v14, %v63_v13  ;;  %v344_v20 = vld [vmem:[%s2026_s3 + $0x30] sm:$0xff]  ;;  %v345_v21 = vld [vmem:[%s2026_s3 + $0x38] sm:$0xff] }
  0x1e   :  { %1285 = vmatpush3.bf16.msra.mxu0 %v1284_v58  ;;  %v342_v15 = vld [vmem:[%s2026_s3 + $0x20] sm:$0xff]  ;;  %v1346_v22 = vpack.c.bf16 %v345_v21, %v344_v20  ;;  %v335_v23 = vld [vmem:[%s2028_s5 + $0x8] sm:$0xff]  ;;  %v336_v24 = vld [vmem:[%s2028_s5 + $0x10] sm:$0xff] }
  0x1f   :  { %1287 = vmatprep.subr.bf16.mxu0 %v1286_v60  ;;  %v1342_v19 = vpack.c.bf16 %v343_v16, %v342_v15  ;;  %v337_v25 = vld [vmem:[%s2028_s5 + $0x18] sm:$0xff]  ;;  %v47_v26 = vld [vmem:[%s2024_s1 + $0x70] sm:$0xff]  ;;  %v246_v29 = vld [vmem:[%s2025_s2 + $0x80] sm:$0xff] }
  0x20   :  { %1321 = vmatpush3.bf16.msra.mxu1 %v1320_v59  ;;  %v48_v27 = vld [vmem:[%s2024_s1 + $0x78] sm:$0xff]  ;;  %v247_v30 = vld [vmem:[%s2025_s2 + $0x88] sm:$0xff]  ;;  %v67_v33 = vld [vmem:[%s2023_s0] sm:$0xff] }
  0x21   :  { %1335 = vmatprep.subr.bf16.mxu1 %v1334_v63  ;;  %v1296_v28 = vpack.c.bf16 %v48_v27, %v47_v26  ;;  %v68_v31 = vld [vmem:[%s2023_s0 + $0x8] sm:$0xff]  ;;  %v1323_v32 = vpack.c.bf16 %v247_v30, %v246_v29  ;;  %v248_v34 = vld [vmem:[%s2025_s2 + $0x90] sm:$0xff]  ;;  %v249_v35 = vld [vmem:[%s2025_s2 + $0x98] sm:$0xff] }
  0x22   :  { %1289 = vmatpush3.bf16.msra.mxu0 %v1288_v5  ;;  %135 = vmatprep.mubr.f32.mxu0 %v68_v31  ;;  %v1326_v36 = vpack.c.bf16 %v249_v35, %v248_v34  ;;  %v250_v37 = vld [vmem:[%s2025_s2 + $0xa0] sm:$0xff]  ;;  %v251_v38 = vld [vmem:[%s2025_s2 + $0xa8] sm:$0xff]  ;;  %v70_v40 = vld [vmem:[%s2023_s0 + $0x18] sm:$0xff] }
  0x23   :  { %1177 = vmatmul.mubr.f32.vlgmr.msra.gmra.mrb[0].mxu1 %v149_v7  ;;  %1291 = vmatprep.subr.bf16.mxu0 %v1290_v12  ;;  %v1329_v39 = vpack.c.bf16 %v251_v38, %v250_v37  ;;  %v252_v41 = vld [vmem:[%s2025_s2 + $0xb0] sm:$0xff]  ;;  %v253_v42 = vld [vmem:[%s2025_s2 + $0xb8] sm:$0xff]  ;;  %v468_v45 = vld [vmem:[%s2026_s3 + $0x40] sm:$0xff] }
  0x24   :  { %1337 = vmatpush3.bf16.msra.mxu1 %v1334_v63  ;;  %1214 = vmatprep.mubr.msk.f32.mxu1 %vm259_vm1, %v334_v11  ;;  %v69_v43 = vld [vmem:[%s2023_s0 + $0x10] sm:$0xff]  ;;  %v1332_v44 = vpack.c.bf16 %v253_v42, %v252_v41  ;;  %v469_v46 = vld [vmem:[%s2026_s3 + $0x48] sm:$0xff]  ;;  %v1009_v49 = vld [vmem:[%s2025_s2 + $0xc0] ss:$0 sm:$0xff] }
  0x25   :  { %1339 = vmatprep.subr.bf16.mxu1 %v1338_v10  ;;  %v1350_v47 = vpack.c.bf16 %v469_v46, %v468_v45  ;;  %v1012_v54 = vld [vmem:[%s2026_s3 + $0x60] ss:$0 sm:$0xff]  ;;  %v65_v26 = vld [vmem:[%s2024_s1 + $0x150] sm:$0xff]  ;;  %v66_v31 = vld [vmem:[%s2024_s1 + $0x158] sm:$0xff] }
  0x26   :  { %1293 = vmatpush3.bf16.msra.mxu0 %v1292_v17  ;;  %v1010_v35 = vld [vmem:[%s2025_s2 + $0xc1] ss:$0 sm:$0xff] }
  0x27   :  { %1295 = vmatprep.subr.bf16.mxu0 %v1294_v18 }
  0x28   :  { %1341 = vmatpush3.bf16.msra.mxu1 %v1338_v10 }
  0x29   :  { %1343 = vmatprep.subr.bf16.mxu1 %v1342_v19 }
  0x2a   :  { %1297 = vmatpush3.bf16.msra.mxu0 %v1296_v28 }
  0x2b   :  { %1322 = vmatprep.subr.bf16.mxu0 %v1539_v3 }
  0x2c   :  { %1345 = vmatpush3.bf16.msra.mxu1 %v1342_v19 }
  0x2d   :  { %1347 = vmatprep.subr.bf16.mxu1 %v1346_v22  ;;  %136 = vmatmul.mubr.f32.vlgmr.msra.gmra.mrb[0].mxu0 %v67_v33 }
  0x2e   :  { %1324 = vmatpush3.bf16.msra.mxu0 %v1323_v32  ;;  %140 = vmatprep.mubr.f32.mxu0 %v70_v40 }
  0x2f   :  { %1325 = vmatprep.subr.bf16.mxu0 %v1539_v3 }
  0x30   :  { %1349 = vmatpush3.bf16.msra.mxu1 %v1346_v22 }
  0x31   :  { %141 = vmatmul.mubr.f32.gmra.mrb[2].mxu0 %v69_v43  ;;  %1351 = vmatprep.subr.bf16.mxu1 %v1350_v47 }
  0x32   :  { %1327 = vmatpush3.bf16.msra.mxu0 %v1326_v36  ;;  %1195 = vmatprep.mubr.msk.f32.mxu0 %vm1540_vm0, %v1541_v6  ;;  %v471_v6 = vld [vmem:[%s2026_s3 + $0x58] sm:$0xff] }
  0x33   :  { %1215 = vmatmul.mubr.msk.f32.vlgmr.msra.gmra.mrb[2].mxu1 %vm259_vm1, %v335_v23  ;;  %1328 = vmatprep.subr.bf16.mxu0 %v1539_v3 }
  0x34   :  { %1217 = vmatprep.mubr.msk.f32.mxu1 %vm259_vm1, %v336_v24  ;;  %1353 = vmatpush3.bf16.msra.mxu1 %v1350_v47 }
  0x36   :  { %1330 = vmatpush3.bf16.msra.mxu0 %v1329_v39  ;;  %v1017_v39 = vld [vmem:[%s2026_s3 + $0x61] ss:$0 sm:$0xff] }
  0x37   :  { %1218 = vmatmul.mubr.msk.f32.gmra.mrb[4].mxu1 %vm259_vm1, %v337_v25  ;;  %1331 = vmatprep.subr.bf16.mxu0 %v1539_v3  ;;  %v470_v3 = vld [vmem:[%s2026_s3 + $0x50] sm:$0xff] }
  0x38   :  { %v1354_v48 = vpack.c.bf16 %v471_v6, %v470_v3 }
  0x3a   :  { %1333 = vmatpush3.bf16.msra.mxu0 %v1332_v44  ;;  %1355 = vmatprep.subr.bf16.mxu1 %v1354_v48 }
  0x3b   :  { %1357 = vmatpush3.bf16.msra.mxu1 %v1354_v48 }
  0xf6   :  { %v237_v50 = vpop.f32.mrb[0].mxu1 }
  0xf7   :  { %v238_v51 = vadd.f32 %v1009_v49, %v237_v50  ;;  %v1178_v52 = vpop.f32.mrb[1].mxu1 }
  0xf9   :  { %v242_v53 = vmul.f32 0.70710677, %v238_v51  ;;  %v241_v56 = vmul.f32 0.5, %v238_v51 }
  0xfb   :  { %1387 = verf.f32 %v242_v53 }
 0x100   :  { %v1074_v25 = vpop.f32.mrb[0].mxu0 }
 0x101   :  { %v1075_v27 = vpop.f32.mrb[1].mxu0 }
 0x102   :  { %v1076_v28 = vadd.f32 %v1075_v27, %v1074_v25  ;;  %v1022_v27 = vld [vmem:[%s2026_s3 + $0x62] ss:$0 sm:$0xff] }
 0x104   :  { %v138_v29 = vadd.f32 %v1076_v28, %v65_v26  ;;  %v1077_v30 = vpop.f32.mrb[2].mxu0 }
 0x105   :  { %v1388_v55 = vpop.eup %1387  ;;  %v1078_v32 = vpop.f32.mrb[3].mxu0 }
 0x106   :  { %v244_v57 = vadd.f32 1.0, %v1388_v55  ;;  %v1216_v58 = vpop.f32.mrb[2].mxu1  ;;  %147 = vst.msk [vmem:[#allocation2] sm:$0xff] %vm146_vm3, %v138_v29  ;;  %v1079_v33 = vadd.f32 %v1078_v32, %v1077_v30  ;;  %v1023_v29 = vld [vmem:[%s2026_s3 + $0x63] ss:$0 sm:$0xff] }
 0x107   :  { %v435_v59 = vadd.f32 %v1216_v58, %v1012_v54  ;;  %v429_v60 = vpop.f32.mrb[3].mxu1 }
 0x108   :  { %v245_v61 = vmul.f32 %v244_v57, %v241_v56  ;;  %v430_v62 = vadd.f32 %v1012_v54, %v429_v60  ;;  %v143_v34 = vadd.f32 %v1079_v33, %v66_v31 }
 0x109   :  { %v453_v63 = vmul.f32 0.70710677, %v435_v59  ;;  %v449_v14 = vmul.f32 0.5, %v435_v59 }
 0x10a   :  { %v452_v0 = vmul.f32 0.70710677, %v430_v62  ;;  %1196 = vmatmul.mubr.msk.f32.vlgmr.msra.gmra.mrb[4].mxu0 %vm259_vm1, %v245_v61  ;;  %v1219_v1 = vpop.f32.mrb[4].mxu1  ;;  %v448_v12 = vmul.f32 0.5, %v430_v62  ;;  %148 = vst.msk [vmem:[#allocation2 + $0x8] sm:$0xff] %vm146_vm3, %v143_v34 }
 0x10b   :  { %1389 = verf.f32 %v453_v63  ;;  %v445_v2 = vadd.f32 %v1219_v1, %v1012_v54  ;;  %v439_v4 = vpop.f32.mrb[5].mxu1 }
 0x10c   :  { %1391 = verf.f32 %v452_v0  ;;  %v440_v5 = vadd.f32 %v1012_v54, %v439_v4 }
 0x10d   :  { %v455_v7 = vmul.f32 0.70710677, %v445_v2  ;;  %v451_v22 = vmul.f32 0.5, %v445_v2 }
 0x10e   :  { %v454_v8 = vmul.f32 0.70710677, %v440_v5  ;;  %v450_v20 = vmul.f32 0.5, %v440_v5 }
 0x10f   :  { %1393 = verf.f32 %v455_v7 }
 0x110   :  { %1395 = verf.f32 %v454_v8  ;;  %v646_v8 = vld [vmem:[%s2024_s1 + $0x100] sm:$0xff] }
 0x115   :  { %v1390_v9 = vpop.eup %1389 }
 0x116   :  { %v1392_v10 = vpop.eup %1391  ;;  %v461_v11 = vadd.f32 1.0, %v1390_v9  ;;  %v647_v9 = vld [vmem:[%s2024_s1 + $0x108] sm:$0xff] }
 0x117   :  { %v460_v13 = vadd.f32 1.0, %v1392_v10  ;;  %v1358_v10 = vpack.c.bf16 %v647_v9, %v646_v8 }
 0x118   :  { %v465_v18 = vmul.f32 %v461_v11, %v449_v14  ;;  %v648_v11 = vld [vmem:[%s2024_s1 + $0x110] sm:$0xff] }
 0x119   :  { %v1394_v15 = vpop.eup %1393  ;;  %v464_v16 = vmul.f32 %v460_v13, %v448_v12  ;;  %1359 = vmatprep.subr.bf16.mxu1 %v1358_v10  ;;  %v649_v12 = vld [vmem:[%s2024_s1 + $0x118] sm:$0xff] }
 0x11a   :  { %v1396_v17 = vpop.eup %1395  ;;  %v463_v19 = vadd.f32 1.0, %v1394_v15  ;;  %v1362_v13 = vpack.c.bf16 %v649_v12, %v648_v11 }
 0x11b   :  { %v462_v21 = vadd.f32 1.0, %v1396_v17  ;;  %1228 = vmatprep.mubr.msk.f32.mxu1 %vm477_vm2, %v464_v16 }
 0x11c   :  { %1229 = vmatmul.mubr.msk.f32.vlgmr.msra.gmra.mrb[6].mxu1 %vm477_vm2, %v465_v18  ;;  %v467_v24 = vmul.f32 %v463_v19, %v451_v22 }
 0x11d   :  { %v466_v23 = vmul.f32 %v462_v21, %v450_v20  ;;  %1361 = vmatpush3.bf16.msra.mxu1 %v1358_v10 }
 0x11e   :  { %1363 = vmatprep.subr.bf16.mxu1 %v1362_v13 }
 0x11f   :  { %1231 = vmatprep.mubr.msk.f32.mxu1 %vm477_vm2, %v466_v23 }
 0x120   :  { %1232 = vmatmul.mubr.msk.f32.gmra.mrb[8].mxu1 %vm477_vm2, %v467_v24 }
 0x121   :  { %1365 = vmatpush3.bf16.msra.mxu1 %v1362_v13 }
 0x1dd   :  { %v329_v36 = vpop.f32.mrb[4].mxu0 }
 0x1de   :  { %v330_v37 = vadd.f32 %v1010_v35, %v329_v36  ;;  %v1197_v38 = vpop.f32.mrb[5].mxu0 }
 0x1e0   :  { %333 = vst.msk [vmem:[#allocation4] sm:$0xff] %vm259_vm1, %v330_v37 }
 0x1ef   :  { %v1230_v40 = vpop.f32.mrb[6].mxu1 }
 0x1f0   :  { %v556_v41 = vpop.f32.mrb[7].mxu1  ;;  %v562_v43 = vadd.f32 %v1230_v40, %v1017_v39 }
 0x1f1   :  { %v557_v42 = vadd.f32 %v1017_v39, %v556_v41 }
 0x1f2   :  { %v578_v48 = vsel %vm477_vm2, %v562_v43, 0.0 }
 0x1f3   :  { %v1233_v44 = vpop.f32.mrb[8].mxu1  ;;  %v575_v45 = vsel %vm477_vm2, %v557_v42, 0.0 }
 0x1f4   :  { %v566_v46 = vpop.f32.mrb[9].mxu1  ;;  %576 = vadd.xlane.f32.xlu0 %v575_v45  ;;  %v572_v3 = vadd.f32 %v1233_v44, %v1017_v39  ;;  %v772_v44 = vld [vmem:[%s2024_s1 + $0x120] sm:$0xff]  ;;  %v773_v45 = vld [vmem:[%s2024_s1 + $0x128] sm:$0xff] }
 0x1f5   :  { %v567_v47 = vadd.f32 %v1017_v39, %v566_v46  ;;  %v1366_v46 = vpack.c.bf16 %v773_v45, %v772_v44 }
 0x1f6   :  { %v584_v49 = vsel %vm477_vm2, %v572_v3, 0.0 }
 0x1f7   :  { %v581_v6 = vsel %vm477_vm2, %v567_v47, 0.0  ;;  %1367 = vmatprep.subr.bf16.mxu0 %v1366_v46 }
 0x1f8   :  { %582 = vadd.xlane.f32.xlu1 %v581_v6  ;;  %579 = vadd.xlane.f32.xlu0 %v578_v48  ;;  %v776_v48 = vld [vmem:[%s2024_s1 + $0x140] sm:$0xff] }
 0x1f9   :  { %1369 = vmatpush3.bf16.msra.mxu0 %v1366_v46 }
 0x1fc   :  { %585 = vadd.xlane.f32.xlu1 %v584_v49  ;;  %v777_v49 = vld [vmem:[%s2024_s1 + $0x148] sm:$0xff] }
 0x281   :  { %v577_v50 = vpop.xlane.xlu0 %576 }
 0x282   :  { %v588_v51 = vmul.f32 0.03125, %v577_v50  ;;  %v1374_v50 = vpack.c.bf16 %v777_v49, %v776_v48 }
 0x284   :  { %v592_v52 = vsub.f32 %v557_v42, %v588_v51  ;;  %v1024_v51 = vld [vmem:[%s2024_s1 + $0x160] ss:$0 sm:$0xff] }
 0x285   :  { %v583_v53 = vpop.xlane.xlu1 %582  ;;  %v580_v54 = vpop.xlane.xlu0 %579 }
 0x286   :  { %v590_v55 = vmul.f32 0.03125, %v583_v53  ;;  %v589_v56 = vmul.f32 0.03125, %v580_v54  ;;  %v596_v57 = vmul.f32 %v592_v52, %v592_v52 }
 0x288   :  { %v594_v58 = vsub.f32 %v567_v47, %v590_v55  ;;  %v593_v59 = vsub.f32 %v562_v43, %v589_v56  ;;  %v600_v60 = vsel %vm477_vm2, %v596_v57, 0.0  ;;  %v774_v47 = vld [vmem:[%s2024_s1 + $0x130] sm:$0xff] }
 0x289   :  { %v586_v61 = vpop.xlane.xlu1 %585  ;;  %601 = vadd.xlane.f32.xlu0 %v600_v60 }
 0x28a   :  { %v591_v62 = vmul.f32 0.03125, %v586_v61  ;;  %v598_v63 = vmul.f32 %v594_v58, %v594_v58  ;;  %v597_v0 = vmul.f32 %v593_v59, %v593_v59 }
 0x28c   :  { %v595_v1 = vsub.f32 %v572_v3, %v591_v62  ;;  %v606_v2 = vsel %vm477_vm2, %v598_v63, 0.0  ;;  %v603_v4 = vsel %vm477_vm2, %v597_v0, 0.0  ;;  %v775_v3 = vld [vmem:[%s2024_s1 + $0x138] sm:$0xff] }
 0x28d   :  { %607 = vadd.xlane.f32.xlu0 %v606_v2  ;;  %604 = vadd.xlane.f32.xlu1 %v603_v4  ;;  %v1370_v6 = vpack.c.bf16 %v775_v3, %v774_v47 }
 0x28e   :  { %v599_v5 = vmul.f32 %v595_v1, %v595_v1 }
 0x28f   :  { %1371 = vmatprep.subr.bf16.mxu0 %v1370_v6 }
 0x290   :  { %v609_v7 = vsel %vm477_vm2, %v599_v5, 0.0  ;;  %1373 = vmatpush3.bf16.msra.mxu0 %v1370_v6 }
 0x291   :  { %610 = vadd.xlane.f32.xlu1 %v609_v7  ;;  %1375 = vmatprep.subr.bf16.mxu0 %v1374_v50 }
 0x294   :  { %1377 = vmatpush3.bf16.msra.mxu0 %v1374_v50 }
 0x316   :  { %v602_v14 = vpop.xlane.xlu0 %601 }
 0x317   :  { %v612_v15 = vmul.f32 0.03125, %v602_v14 }
 0x319   :  { %v616_v16 = vadd.f32 1e-05, %v612_v15 }
 0x31a   :  { %v605_v17 = vpop.xlane.xlu1 %604  ;;  %v608_v18 = vpop.xlane.xlu0 %607 }
 0x31b   :  { %1397 = vrsqrt.f32 %v616_v16  ;;  %v613_v19 = vmul.f32 0.03125, %v605_v17  ;;  %v614_v20 = vmul.f32 0.03125, %v608_v18  ;;  %v884_v18 = vld [vmem:[%s2029_s6] sm:$0xff] }
 0x31d   :  { %v617_v21 = vadd.f32 1e-05, %v613_v19  ;;  %v618_v22 = vadd.f32 1e-05, %v614_v20  ;;  %v885_v19 = vld [vmem:[%s2029_s6 + $0x8] sm:$0xff]  ;;  %v886_v20 = vld [vmem:[%s2029_s6 + $0x10] sm:$0xff] }
 0x31e   :  { %v611_v23 = vpop.xlane.xlu1 %610 }
 0x31f   :  { %1399 = vrsqrt.f32 %v617_v21  ;;  %v615_v24 = vmul.f32 0.03125, %v611_v23  ;;  %v887_v21 = vld [vmem:[%s2029_s6 + $0x18] sm:$0xff]  ;;  %v889_v23 = vld [vmem:[%s2029_s6 + $0x28] sm:$0xff] }
 0x320   :  { %1401 = vrsqrt.f32 %v618_v22  ;;  %v888_v22 = vld [vmem:[%s2029_s6 + $0x20] sm:$0xff] }
 0x321   :  { %v619_v25 = vadd.f32 1e-05, %v615_v24  ;;  %v1034_v24 = vmul.f32 -1.442695, %v884_v18 }
 0x323   :  { %1403 = vrsqrt.f32 %v619_v25  ;;  %v890_v25 = vld [vmem:[%s2029_s6 + $0x30] sm:$0xff] }
 0x325   :  { %v1398_v26 = vpop.eup %1397 }
 0x326   :  { %v624_v28 = vmul.f32 %v1398_v26, %v592_v52  ;;  %v1035_v26 = vmul.f32 -1.442695, %v885_v19 }
 0x328   :  { %v633_v30 = vmul.f32 %v1022_v27, %v624_v28  ;;  %v891_v28 = vld [vmem:[%s2029_s6 + $0x38] sm:$0xff]  ;;  %s1542_s6 = smov [#allocation4]  }
 0x329   :  { %v1400_v31 = vpop.eup %1399  ;;  %s966_s25 = sshll.u32 %s1542_s6, 4  ;;  %s967_s25 = int_to_ptr.vmem [resolvable:$true] %s966_s25 }
 0x32a   :  { %v1402_v32 = vpop.eup %1401  ;;  %v625_v33 = vmul.f32 %v1400_v31, %v593_v59  ;;  %v642_v34 = vadd.f32 %v1023_v29, %v633_v30  ;;  %v1038_v30 = vmul.f32 -1.442695, %v888_v22  ;;  %v1039_v31 = vmul.f32 -1.442695, %v889_v23  ;;  %s1445_s28 = scalar_lea.vmem %s967_s25, 128  ;;  %p1450_p1 = scmp.lt.s32.totalorder %s967_s25, %s967_s25 }
 0x32b   :  { %v626_v35 = vmul.f32 %v1402_v32, %v594_v58  ;;  %v1040_v32 = vmul.f32 -1.442695, %v890_v25  ;;  %p1446_p0 = scmp.ne.s32.totalorder %s967_s25, %s1445_s28  ;;  %p1451_p2 = scmp.lt.s32.totalorder %s1445_s28, %s1445_s28 }
 0x32c   :  { %v634_v36 = vmul.f32 %v1022_v27, %v625_v33  ;;  %1242 = vmatprep.mubr.msk.f32.mxu1 %vm477_vm2, %v642_v34  ;;  %v1041_v33 = vmul.f32 -1.442695, %v891_v28 }
 0x32d   :  { %v1404_v37 = vpop.eup %1403  ;;  %v635_v38 = vmul.f32 %v1022_v27, %v626_v35  ;;  %p1452_p3 = por %p1451_p2, %p1450_p1 }
 0x32e   :  { %v643_v39 = vadd.f32 %v1023_v29, %v634_v36  ;;  %v627_v40 = vmul.f32 %v1404_v37, %v595_v1 }
 0x32f   :  { %v644_v41 = vadd.f32 %v1023_v29, %v635_v38  ;;  %p1453_p4 = pnand %p1452_p3, %p1446_p0 }
 0x330   :  { %1243 = vmatmul.mubr.msk.f32.vlgmr.msra.gmra.mrb[10].mxu1 %vm477_vm2, %v643_v39  ;;  %v636_v42 = vmul.f32 %v1022_v27, %v627_v40  ;;  %v1036_v27 = vmul.f32 -1.442695, %v886_v20 }
 0x331   :  { %1245 = vmatprep.mubr.msk.f32.mxu1 %vm477_vm2, %v644_v41 }
 0x332   :  { %v645_v43 = vadd.f32 %v1023_v29, %v636_v42  ;;  %v1037_v29 = vmul.f32 -1.442695, %v887_v21 }
 0x334   :  { %1246 = vmatmul.mubr.msk.f32.gmra.mrb[12].mxu1 %vm477_vm2, %v645_v43 }
 0x403   :  { %v1244_v52 = vpop.f32.mrb[10].mxu1 }
 0x404   :  { %v739_v53 = vadd.f32 %v1244_v52, %v1024_v51  ;;  %v733_v54 = vpop.f32.mrb[11].mxu1 }
 0x405   :  { %v734_v55 = vadd.f32 %v1024_v51, %v733_v54 }
 0x406   :  { %v757_v56 = vmul.f32 0.70710677, %v739_v53  ;;  %v753_v7 = vmul.f32 0.5, %v739_v53 }
 0x407   :  { %v756_v57 = vmul.f32 0.70710677, %v734_v55  ;;  %v1247_v58 = vpop.f32.mrb[12].mxu1  ;;  %v752_v4 = vmul.f32 0.5, %v734_v55 }
 0x408   :  { %1405 = verf.f32 %v757_v56  ;;  %v749_v59 = vadd.f32 %v1247_v58, %v1024_v51  ;;  %v743_v60 = vpop.f32.mrb[13].mxu1 }
 0x409   :  { %1407 = verf.f32 %v756_v57  ;;  %v744_v61 = vadd.f32 %v1024_v51, %v743_v60 }
 0x40a   :  { %v759_v62 = vmul.f32 0.70710677, %v749_v59  ;;  %v755_v15 = vmul.f32 0.5, %v749_v59 }
 0x40b   :  { %v758_v63 = vmul.f32 0.70710677, %v744_v61  ;;  %v754_v13 = vmul.f32 0.5, %v744_v61 }
 0x40c   :  { %1409 = verf.f32 %v759_v62 }
 0x40d   :  { %1411 = verf.f32 %v758_v63 }
 0x40e   :  { %1413 = vpow2.f32 %v1034_v24 }
 0x40f   :  { %1415 = vpow2.f32 %v1035_v26 }
 0x410   :  { %1417 = vpow2.f32 %v1036_v27 }
 0x411   :  { %1419 = vpow2.f32 %v1037_v29 }
 0x412   :  { %v1406_v0 = vpop.eup %1405  ;;  %1421 = vpow2.f32 %v1038_v30 }
 0x413   :  { %v1408_v1 = vpop.eup %1407  ;;  %v765_v2 = vadd.f32 1.0, %v1406_v0  ;;  %1423 = vpow2.f32 %v1039_v31 }
 0x414   :  { %v764_v5 = vadd.f32 1.0, %v1408_v1  ;;  %1425 = vpow2.f32 %v1040_v32 }
 0x415   :  { %v769_v11 = vmul.f32 %v765_v2, %v753_v7  ;;  %1427 = vpow2.f32 %v1041_v33 }
 0x416   :  { %v1410_v8 = vpop.eup %1409  ;;  %v768_v9 = vmul.f32 %v764_v5, %v752_v4 }
 0x417   :  { %v1412_v10 = vpop.eup %1411  ;;  %v767_v12 = vadd.f32 1.0, %v1410_v8 }
 0x418   :  { %v766_v14 = vadd.f32 1.0, %v1412_v10  ;;  %1260 = vmatprep.mubr.msk.f32.mxu0 %vm146_vm3, %v768_v9  ;;  %v1414_v34 = vpop.eup %1413 }
 0x419   :  { %1261 = vmatmul.mubr.msk.f32.vlgmr.msra.gmra.mrb[6].mxu0 %vm146_vm3, %v769_v11  ;;  %v771_v17 = vmul.f32 %v767_v12, %v755_v15  ;;  %v1416_v35 = vpop.eup %1415  ;;  %v916_v36 = vadd.f32 1.0, %v1414_v34 }
 0x41a   :  { %v770_v16 = vmul.f32 %v766_v14, %v754_v13  ;;  %v1418_v37 = vpop.eup %1417  ;;  %v917_v38 = vadd.f32 1.0, %v1416_v35 }
 0x41b   :  { %v1420_v39 = vpop.eup %1419  ;;  %v918_v40 = vadd.f32 1.0, %v1418_v37  ;;  %1429 = vrcp.f32 %v916_v36 }
 0x41c   :  { %1263 = vmatprep.mubr.msk.f32.mxu0 %vm146_vm3, %v770_v16  ;;  %v1422_v41 = vpop.eup %1421  ;;  %v919_v42 = vadd.f32 1.0, %v1420_v39  ;;  %1431 = vrcp.f32 %v917_v38 }
 0x41d   :  { %1264 = vmatmul.mubr.msk.f32.gmra.mrb[8].mxu0 %vm146_vm3, %v771_v17  ;;  %v1424_v43 = vpop.eup %1423  ;;  %v920_v44 = vadd.f32 1.0, %v1422_v41  ;;  %1433 = vrcp.f32 %v918_v40 }
 0x41e   :  { %v1426_v45 = vpop.eup %1425  ;;  %v921_v46 = vadd.f32 1.0, %v1424_v43  ;;  %1435 = vrcp.f32 %v919_v42 }
 0x41f   :  { %v1428_v47 = vpop.eup %1427  ;;  %v922_v3 = vadd.f32 1.0, %v1426_v45  ;;  %1437 = vrcp.f32 %v920_v44 }
 0x420   :  { %v923_v6 = vadd.f32 1.0, %v1428_v47  ;;  %1439 = vrcp.f32 %v921_v46 }
 0x421   :  { %1441 = vrcp.f32 %v922_v3 }
 0x422   :  { %1443 = vrcp.f32 %v923_v6 }
 0x425   :  { %v1430_v48 = vpop.eup %1429 }
 0x426   :  { %v1432_v49 = vpop.eup %1431 }
 0x427   :  { %1456 = shalt.err (!%p1453_p4)
}
 0x428   :  { %s1457_s11 = scalar_lea.hbm %s2031_s8, 128 }
 0x429   :  { %p1458_p5 = scmp.ne.s32.totalorder %s2031_s8, %s1457_s11  ;;  %p1461_p6 = scmp.lt.u32.totalorder %s1457_s11, %s2031_s8 }
 0x42b   :  { %p1463_p7 = pnand %p1461_p6, %p1458_p5 }
 0x42d   :  { %1466 = shalt.err (!%p1463_p7)
}
 0x42e   :  { %969 = dma.vmem_to_hbm [thread:$0]  %s967_s25, 128, %s2031_s8, [#allocation5]   ;;  %940 = vst [vmem:[#allocation7] sm:$0xff] %v1430_v48  ;;  %v1434_v50 = vpop.eup %1433  ;;  %941 = vst [vmem:[#allocation7 + $0x8] sm:$0xff] %v1432_v49 }
 0x42f   :  { %v1436_v51 = vpop.eup %1435  ;;  %942 = vst [vmem:[#allocation7 + $0x10] sm:$0xff] %v1434_v50  ;;  %s1467_s5 = scalar_lea.vmem %s954_s27, 256  ;;  %p1472_p9 = scmp.lt.s32.totalorder %s954_s27, %s954_s27 }
 0x430   :  { %v1438_v52 = vpop.eup %1437  ;;  %p1468_p8 = scmp.ne.s32.totalorder %s954_s27, %s1467_s5  ;;  %p1473_p10 = scmp.lt.s32.totalorder %s1467_s5, %s1467_s5 }
 0x432   :  { %p1474_p11 = por %p1473_p10, %p1472_p9 }
 0x434   :  { %p1475_p12 = pnand %p1474_p11, %p1468_p8 }
 0x436   :  { %1478 = shalt.err (!%p1475_p12)
}
 0x437   :  { %s1479_s0 = scalar_lea.hbm %s2030_s7, 256 }
 0x438   :  { %p1480_p13 = scmp.ne.s32.totalorder %s2030_s7, %s1479_s0  ;;  %p1483_p0 = scmp.lt.u32.totalorder %s1479_s0, %s2030_s7 }
 0x43a   :  { %p1485_p1 = pnand %p1483_p0, %p1480_p13 }
 0x43c   :  { %1488 = shalt.err (!%p1485_p1)
}
 0x43d   :  { %s1544_s3 = smov 128   ;;  %s1545_s21 = smov 8   ;;  %943 = vst [vmem:[#allocation7 + $0x18] sm:$0xff] %v1436_v51  ;;  %v1440_v53 = vpop.eup %1439  ;;  %944 = vst [vmem:[#allocation7 + $0x20] sm:$0xff] %v1438_v52 }
 0x43e   :  { %959 = dma.vmem_to_hbm [thread:$0]  %s954_s27, 256, %s2030_s7, [#allocation3], %s1544_s3, %s1544_s3, %s1545_s21   ;;  %v1442_v54 = vpop.eup %1441  ;;  %945 = vst [vmem:[#allocation7 + $0x28] sm:$0xff] %v1440_v53 }
 0x43f   :  { %s1546_s24 = smov [#allocation7]   ;;  %v1444_v55 = vpop.eup %1443  ;;  %946 = vst [vmem:[#allocation7 + $0x30] sm:$0xff] %v1442_v54 }
 0x440   :  { %s987_s6 = sshll.u32 %s1546_s24, 4  ;;  %947 = vst [vmem:[#allocation7 + $0x38] sm:$0xff] %v1444_v55  ;;  %s988_s6 = int_to_ptr.vmem [resolvable:$true] %s987_s6 }
 0x441   :  { %s1489_s25 = scalar_lea.vmem %s988_s6, 1024  ;;  %p1494_p3 = scmp.lt.s32.totalorder %s988_s6, %s988_s6 }
 0x442   :  { %p1490_p2 = scmp.ne.s32.totalorder %s988_s6, %s1489_s25  ;;  %p1495_p4 = scmp.lt.s32.totalorder %s1489_s25, %s1489_s25 }
 0x444   :  { %p1496_p5 = por %p1495_p4, %p1494_p3 }
 0x446   :  { %p1497_p6 = pnand %p1496_p5, %p1490_p2 }
 0x448   :  { %1500 = shalt.err (!%p1497_p6)
}
 0x449   :  { %s1501_s27 = scalar_lea.hbm %s2033_s10, 1024 }
 0x44a   :  { %p1502_p7 = scmp.ne.s32.totalorder %s2033_s10, %s1501_s27  ;;  %p1505_p8 = scmp.lt.u32.totalorder %s1501_s27, %s2033_s10 }
 0x44c   :  { %p1507_p9 = pnand %p1505_p8, %p1502_p7 }
 0x44e   :  { %1510 = shalt.err (!%p1507_p9)
}
 0x44f   :  { %993 = dma.vmem_to_hbm [thread:$0]  %s988_s6, 1024, %s2033_s10, [#allocation8], %s1544_s3, %s1544_s3, %s1545_s21  }
 0x450   :  { %v1029_v56 = vld [vmem:[%s2024_s1 + $0x161] ss:$0 sm:$0xff]  ;;  %s1547_s4 = smov [#allocation6]  }
 0x451   :  { %s975_s15 = sshll.u32 %s1547_s4, 4  ;;  %s976_s15 = int_to_ptr.vmem [resolvable:$true] %s975_s15 }
 0x452   :  { %s1511_s1 = scalar_lea.vmem %s976_s15, 512  ;;  %p1516_p11 = scmp.lt.s32.totalorder %s976_s15, %s976_s15 }
 0x453   :  { %p1512_p10 = scmp.ne.s32.totalorder %s976_s15, %s1511_s1  ;;  %p1517_p12 = scmp.lt.s32.totalorder %s1511_s1, %s1511_s1 }
 0x455   :  { %p1518_p13 = por %p1517_p12, %p1516_p11 }
 0x457   :  { %p1519_p0 = pnand %p1518_p13, %p1512_p10 }
 0x4ec   :  { %v1262_v57 = vpop.f32.mrb[6].mxu0 }
 0x4ed   :  { %v867_v58 = vadd.f32 %v1262_v57, %v1029_v56  ;;  %v861_v59 = vpop.f32.mrb[7].mxu0 }
 0x4ee   :  { %v862_v60 = vadd.f32 %v1029_v56, %v861_v59 }
 0x4ef   :  { %881 = vst.msk [vmem:[#allocation6 + $0x8] sm:$0xff] %vm146_vm3, %v867_v58 }
 0x4f0   :  { %880 = vst.msk [vmem:[#allocation6] sm:$0xff] %vm146_vm3, %v862_v60  ;;  %v1265_v61 = vpop.f32.mrb[8].mxu0 }
 0x4f1   :  { %v877_v62 = vadd.f32 %v1265_v61, %v1029_v56  ;;  %v871_v63 = vpop.f32.mrb[9].mxu0 }
 0x4f2   :  { %v872_v0 = vadd.f32 %v1029_v56, %v871_v63 }
 0x4f3   :  { %883 = vst.msk [vmem:[#allocation6 + $0x18] sm:$0xff] %vm146_vm3, %v877_v62 }
 0x4f4   :  { %882 = vst.msk [vmem:[#allocation6 + $0x10] sm:$0xff] %vm146_vm3, %v872_v0 }
 0x4f5   :  { %1522 = shalt.err (!%p1519_p0)
}
 0x4f6   :  { %s1523_s16 = scalar_lea.hbm %s2032_s9, 512 }
 0x4f7   :  { %p1524_p1 = scmp.ne.s32.totalorder %s2032_s9, %s1523_s16  ;;  %p1527_p2 = scmp.lt.u32.totalorder %s1523_s16, %s2032_s9 }
 0x4f9   :  { %p1529_p3 = pnand %p1527_p2, %p1524_p1 }
 0x4fb   :  { %1532 = shalt.err (!%p1529_p3)
}
 0x4fc   :  { %981 = dma.vmem_to_hbm [thread:$0]  %s976_s15, 512, %s2032_s9, [#allocation5], %s1544_s3, %s1544_s3, %s1545_s21  }
 0x4fd   :  { %1533 = dma.done.wait [#allocation3], 256  }
 0x4fe   :  { %1534 = vsyncadd [#allocation3], 4294967040 }
 0x4ff   :  { %1535 = dma.done.wait [#allocation5], 640  }
 0x500   :  { %1536 = vsyncadd [#allocation5], 4294966656 }
 0x501   :  { %1537 = dma.done.wait [#allocation8], 1024  }
 0x502   :  { %1538 = vsyncadd [#allocation8], 4294966272 }
 0x503   :  { %1006 = vsyncpa [#allocation3], 1 }
 0x504   :  { %1007 = vsyncpa [#allocation5], 1 }
 0x505   :  { %1008 = vsyncpa [#allocation8], 1 }

</bundles_post_ra>
